<compile_context>
chip_gen: v5e
topology: v5e:2x2
jax: 0.10.0
libtpu: 0.0.40
codegen_flags: <defaults>
</compile_context>

<pallas_src>
import functools

import jax
import jax.numpy as jnp
from jax.experimental import pallas as pl
from jax.experimental.pallas import tpu as pltpu


def _conv_tile(x_ref, w_ref, mask_ref, patches_ref, *, width, cin_pad):
    """3x3 conv (padding=1) on a tile of B_tile images.

    Layout (lane-dense): channels on sublanes, flattened spatial on lanes.
      x_ref:       (B_tile, Cin, H*W)   f32 input images
      w_ref:       (Cout, 9*cin_pad)    conv weight, tap-major / cin-minor, zero-padded
      mask_ref:    (9, H*W)             f32 0/1 boundary masks per tap (zero padding)
      patches_ref: (9*cin_pad, H*W)     VMEM im2col scratch (bf16 or f32)
    Returns the conv output as an f32 value of shape (B_tile, Cout, H*W).
    The conv bias is omitted: it is exactly cancelled by the training-mode
    BN batch-mean subtraction.
    """
    bt, cin, hw = x_ref.shape
    w = w_ref[...]          # resident, read once
    mask = mask_ref[...]    # (9, hw)

    need_pad = cin_pad > cin
    if need_pad:
        # Hoisted once: zero rows so every tap stripe is a full, sublane-aligned
        # (cin_pad, hw) store (no masked partial stores into the scratch).
        pad_rows = jnp.zeros((cin_pad - cin, hw), jnp.float32)

    zs = []
    for b in range(bt):
        x = x_ref[b]                                    # (cin, hw) f32
        if need_pad:
            x = jnp.concatenate([x, pad_rows], axis=0)  # (cin_pad, hw)

        # im2col: 9 shifted-and-masked copies.  Shifts are XLU lane rotations
        # (pltpu.roll) on the flattened spatial axis; the precomputed edge
        # masks kill the wrap-around (zero padding).
        t = 0
        for dy in (-1, 0, 1):
            for dx in (-1, 0, 1):
                off = dy * width + dx
                if off == 0:
                    stripe = x
                else:
                    # f32 mask multiply before the cast (v5e: no bf16 VALU).
                    stripe = pltpu.roll(x, shift=(-off) % hw, axis=1) * mask[t:t + 1]
                patches_ref[t * cin_pad:(t + 1) * cin_pad, :] = (
                    stripe.astype(patches_ref.dtype))
                t += 1

        # Single fused MXU matmul per image: (Cout, 9*cin_pad) @ (9*cin_pad, hw),
        # bf16 feed, f32 accumulation.
        zs.append(jnp.dot(w, patches_ref[...],
                          preferred_element_type=jnp.float32))

    return jnp.stack(zs, axis=0)                        # (bt, cout, hw) f32


def conv_stats_kernel(x_ref, w_ref, mask_ref, stats_ref, patches_ref, *,
                      width, cin_pad):
    """Pass 1: conv (not written to HBM) + per-tile partial BN statistics.

    stats_ref: (Cout, 2) -- [:, 0] = per-channel mean over this tile,
                            [:, 1] = per-channel sum of squared deviations (M2).
    """
    z = _conv_tile(x_ref, w_ref, mask_ref, patches_ref,
                   width=width, cin_pad=cin_pad)        # (bt, cout, hw) f32
    bt, cout, hw = z.shape
    inv_n = 1.0 / (bt * hw)

    zsum = jnp.sum(z, axis=0)                                        # (cout, hw)
    mean = jnp.sum(zsum, axis=1, keepdims=True) * inv_n              # (cout, 1)
    centered = z - mean[None, :, :]
    m2 = jnp.sum(jnp.sum(centered * centered, axis=0), axis=1,
                 keepdims=True)                                      # (cout, 1)
    stats_ref[...] = jnp.concatenate([mean, m2], axis=1)             # (cout, 2)


def conv_bn_relu_kernel(x_ref, w_ref, mask_ref, a_ref, c_ref, o_ref,
                        patches_ref, *, width, cin_pad):
    """Pass 2: recompute conv, apply fused BN affine + ReLU, write output."""
    z = _conv_tile(x_ref, w_ref, mask_ref, patches_ref,
                   width=width, cin_pad=cin_pad)        # (bt, cout, hw) f32
    a = a_ref[...][None, :, :]                          # (1, cout, 1)
    c = c_ref[...][None, :, :]
    o_ref[...] = jnp.maximum(z * a + c, 0.0).astype(o_ref.dtype)


def block_forward(x_nchw, w_oihw, bias, gamma, beta, *, eps=1e-5,
                  mxu_dtype=jnp.bfloat16):
    """Pallas equivalent of Block.forward (stride=1, training-mode BN)."""
    # The conv bias is exactly cancelled by the BN batch-mean subtraction in
    # training mode, so it is not applied (re-apply it if eval/running-stats
    # mode is ever needed).
    del bias
    batch, cin, height, width = x_nchw.shape
    cout = w_oihw.shape[0]
    hw = height * width

    # Per-tap stripe padded to the native sublane tile of the patches dtype
    # (16 rows for bf16, 8 for f32) so im2col stores are full, unmasked.
    sub = 8 * (4 // jnp.dtype(mxu_dtype).itemsize)
    cin_pad = ((cin + sub - 1) // sub) * sub

    # Images per grid step: amortize fixed per-step cost but keep several grid
    # steps for pipelining / both v7x TensorCores.
    bt = max(1, min(2048 // max(hw, 1), max(batch // 4, 1)))
    bt = min(bt, batch)
    while batch % bt:
        bt -= 1
    num_tiles = batch // bt

    # Activations: free reshape only (NCHW order preserved), stays f32 in HBM.
    x_flat = x_nchw.reshape(batch, cin, hw)

    # Weight: OIHW -> (Cout, ky, kx, Cin) -> zero-pad Cin -> (Cout, 9*cin_pad),
    # cast to the MXU feed dtype.  Tiny tensor.
    w_taps = jnp.transpose(w_oihw, (0, 2, 3, 1))
    w_taps = jnp.pad(w_taps, ((0, 0), (0, 0), (0, 0), (0, cin_pad - cin)))
    w_mat = w_taps.reshape(cout, 9 * cin_pad).astype(mxu_dtype)

    # Precomputed 0/1 boundary masks for the 9 taps, lane-dense (9, H*W).
    flat = jnp.arange(hw, dtype=jnp.int32)
    hh = flat // width
    ww = flat % width
    masks = []
    for dy in (-1, 0, 1):
        for dx in (-1, 0, 1):
            masks.append((hh + dy >= 0) & (hh + dy < height) &
                         (ww + dx >= 0) & (ww + dx < width))
    tap_mask = jnp.stack(masks, axis=0).astype(jnp.float32)   # (9, hw)

    # ---- Pass 1: per-tile BN statistics only (conv output never hits HBM). --
    kern1 = functools.partial(conv_stats_kernel, width=width, cin_pad=cin_pad)
    stats = pl.pallas_call(
        kern1,
        grid=(num_tiles,),
        in_specs=[
            pl.BlockSpec((bt, cin, hw), lambda i: (i, 0, 0)),       # x tile
            pl.BlockSpec((cout, 9 * cin_pad), lambda i: (0, 0)),    # weight
            pl.BlockSpec((9, hw), lambda i: (0, 0)),                # tap masks
        ],
        out_specs=pl.BlockSpec((None, cout, 2), lambda i: (i, 0, 0)),
        out_shape=jax.ShapeDtypeStruct((num_tiles, cout, 2), jnp.float32),
        scratch_shapes=[pltpu.VMEM((9 * cin_pad, hw), mxu_dtype)],
        compiler_params=pltpu.CompilerParams(
            dimension_semantics=("parallel",)),
    )(x_flat, w_mat, tap_mask)

    # ---- Global batch statistics (O(Cout) work, plain JAX). -----------------
    # Chan's parallel-variance combine of equal-sized chunks: numerically safe,
    # no E[x^2]-E[x]^2 cancellation.
    tile_mean = stats[:, :, 0]                                       # (tiles, cout)
    tile_m2 = stats[:, :, 1]
    chunk = bt * hw
    mean_g = jnp.mean(tile_mean, axis=0)                             # (cout,)
    m2_g = (jnp.sum(tile_m2, axis=0)
            + chunk * jnp.sum((tile_mean - mean_g) ** 2, axis=0))    # (cout,)
    var_g = m2_g / (batch * hw)                                      # biased
    a_vec = jax.lax.rsqrt(var_g + eps) * gamma
    c_vec = beta - mean_g * a_vec
    a = a_vec.reshape(cout, 1).astype(jnp.float32)
    c = c_vec.reshape(cout, 1).astype(jnp.float32)

    # ---- Pass 2: recompute conv + fused BN affine + ReLU -> final output. ---
    kern2 = functools.partial(conv_bn_relu_kernel, width=width, cin_pad=cin_pad)
    out = pl.pallas_call(
        kern2,
        grid=(num_tiles,),
        in_specs=[
            pl.BlockSpec((bt, cin, hw), lambda i: (i, 0, 0)),       # x tile
            pl.BlockSpec((cout, 9 * cin_pad), lambda i: (0, 0)),    # weight
            pl.BlockSpec((9, hw), lambda i: (0, 0)),                # tap masks
            pl.BlockSpec((cout, 1), lambda i: (0, 0)),              # a
            pl.BlockSpec((cout, 1), lambda i: (0, 0)),              # c
        ],
        out_specs=pl.BlockSpec((bt, cout, hw), lambda i: (i, 0, 0)),
        out_shape=jax.ShapeDtypeStruct((batch, cout, hw), jnp.float32),
        scratch_shapes=[pltpu.VMEM((9 * cin_pad, hw), mxu_dtype)],
        compiler_params=pltpu.CompilerParams(
            dimension_semantics=("parallel",)),
    )(x_flat, w_mat, tap_mask, a, c)

    return out.reshape(batch, cout, height, width)


def reference_forward(x_nchw, w_oihw, bias, gamma, beta):
    """Pure-JAX reference mirroring PyTorch semantics (NCHW, with conv bias)."""
    out = jax.lax.conv_general_dilated(
        x_nchw, w_oihw, window_strides=(1, 1), padding=((1, 1), (1, 1)),
        dimension_numbers=("NCHW", "OIHW", "NCHW"))
    out = out + bias[None, :, None, None]
    mean = jnp.mean(out, axis=(0, 2, 3), keepdims=True)
    var = jnp.mean((out - mean) ** 2, axis=(0, 2, 3), keepdims=True)
    out = (out - mean) * jax.lax.rsqrt(var + 1e-5)
    out = out * gamma[None, :, None, None] + beta[None, :, None, None]
    return jnp.maximum(out, 0.0)


if __name__ == "__main__":
    N, Cin, Cout, H, W = 2, 4, 8, 16, 16

    key = jax.random.PRNGKey(0)
    kx, kw, kb = jax.random.split(key, 3)

    x = jax.random.normal(kx, (N, Cin, H, W), dtype=jnp.float32)
    # Deterministic parameter init (shapes from nn.Conv2d / nn.BatchNorm2d).
    w = jax.random.normal(kw, (Cout, Cin, 3, 3), dtype=jnp.float32) * 0.1
    b = jax.random.normal(kb, (Cout,), dtype=jnp.float32) * 0.1
    gamma = jnp.ones((Cout,), dtype=jnp.float32)   # BatchNorm2d default weight
    beta = jnp.zeros((Cout,), dtype=jnp.float32)   # BatchNorm2d default bias

    ref = jax.block_until_ready(reference_forward(x, w, b, gamma, beta))

    # Exact path (f32 MXU feed) -- tight check against PyTorch-style f32 math.
    fwd_f32 = jax.jit(functools.partial(block_forward, mxu_dtype=jnp.float32))
    out_f32 = jax.block_until_ready(fwd_f32(x, w, b, gamma, beta))
    assert out_f32.shape == (N, Cout, H, W), out_f32.shape
    assert jnp.allclose(out_f32, ref, atol=1e-4, rtol=1e-4), \
        float(jnp.max(jnp.abs(out_f32 - ref)))

    # Default fast path: bf16 MXU feed with f32 accumulation (perf review).
    fwd = jax.jit(block_forward)
    out = jax.block_until_ready(fwd(x, w, b, gamma, beta))
    assert out.shape == (N, Cout, H, W), out.shape
    assert jnp.allclose(out, ref, atol=3e-2, rtol=3e-2), \
        float(jnp.max(jnp.abs(out - ref)))

    print("KERNEL_OK")
</pallas_src>

<mosaic_0001>
module attributes {stable_mosaic.version = 11 : i64} {
  func.func @conv_stats_kernel(%arg0: i32, %arg1: memref<1x4x256xf32, #tpu.memory_space<vmem>>, %arg2: memref<8x72xf32, #tpu.memory_space<vmem>>, %arg3: memref<9x256xf32, #tpu.memory_space<vmem>>, %arg4: memref<1x8x2xf32, #tpu.memory_space<vmem>>, %arg5: memref<72x256xf32, #tpu.memory_space<vmem>>) attributes {dimension_semantics = [#tpu.dimension_semantics<parallel>], iteration_bounds = array<i64: 2>, scalar_prefetch = 0 : i64, scratch_operands = 1 : i64, tpu.core_type = #tpu.core_type<tc>, window_params = [{transform_indices = @transform_0, window_bounds = array<i64: 1, 4, 256>}, {pipeline_mode = #tpu.pipeline_mode<synchronous>, transform_indices = @transform_1, window_bounds = array<i64: 8, 72>}, {pipeline_mode = #tpu.pipeline_mode<synchronous>, transform_indices = @transform_2, window_bounds = array<i64: 9, 256>}, {transform_indices = @transform_3, window_bounds = array<i64: 1, 8, 2>}]} {
    %c0 = arith.constant 0 : index
    %c0_0 = arith.constant 0 : index
    %0 = vector.load %arg2[%c0, %c0_0] : memref<8x72xf32, #tpu.memory_space<vmem>>, vector<8x72xf32>
    %c0_1 = arith.constant 0 : index
    %c0_2 = arith.constant 0 : index
    %1 = vector.load %arg3[%c0_1, %c0_2] : memref<9x256xf32, #tpu.memory_space<vmem>>, vector<9x256xf32>
    %cst = arith.constant 0.000000e+00 : f32
    %2 = vector.broadcast %cst : f32 to vector<4x256xf32>
    %c0_3 = arith.constant 0 : index
    %c0_4 = arith.constant 0 : index
    %c0_5 = arith.constant 0 : index
    %3 = vector.load %arg1[%c0_3, %c0_4, %c0_5] : memref<1x4x256xf32, #tpu.memory_space<vmem>>, vector<1x4x256xf32>
    %4 = vector.shape_cast %3 : vector<1x4x256xf32> to vector<4x256xf32>
    %5 = tpu.concatenate %4, %2 in 0 : vector<4x256xf32>, vector<4x256xf32> -> vector<8x256xf32>
    %c17_i32 = arith.constant 17 : i32
    %6 = tpu.dynamic_rotate %5 by %c17_i32 dim 1 : vector<8x256xf32>, i32 -> vector<8x256xf32>
    %7 = vector.extract_strided_slice %1 {offsets = [0, 0], sizes = [1, 256], strides = [1, 1]} : vector<9x256xf32> to vector<1x256xf32>
    %8 = vector.broadcast %7 : vector<1x256xf32> to vector<8x256xf32>
    %9 = arith.mulf %6, %8 : vector<8x256xf32>
    %c0_6 = arith.constant 0 : index
    %c0_7 = arith.constant 0 : index
    %10 = vector.load %arg5[%c0_6, %c0_7] : memref<72x256xf32, #tpu.memory_space<vmem>>, vector<8x256xf32>
    tpu.vector_store %arg5[%c0_6, %c0_7], %9 {strides = array<i32>} : memref<72x256xf32, #tpu.memory_space<vmem>>, vector<8x256xf32>,
    %c16_i32 = arith.constant 16 : i32
    %11 = tpu.dynamic_rotate %5 by %c16_i32 dim 1 : vector<8x256xf32>, i32 -> vector<8x256xf32>
    %12 = vector.extract_strided_slice %1 {offsets = [1, 0], sizes = [1, 256], strides = [1, 1]} : vector<9x256xf32> to vector<1x256xf32>
    %13 = vector.broadcast %12 : vector<1x256xf32> to vector<8x256xf32>
    %14 = arith.mulf %11, %13 : vector<8x256xf32>
    %c8 = arith.constant 8 : index
    %c0_8 = arith.constant 0 : index
    %15 = vector.load %arg5[%c8, %c0_8] : memref<72x256xf32, #tpu.memory_space<vmem>>, vector<8x256xf32>
    tpu.vector_store %arg5[%c8, %c0_8], %14 {strides = array<i32>} : memref<72x256xf32, #tpu.memory_space<vmem>>, vector<8x256xf32>,
    %c15_i32 = arith.constant 15 : i32
    %16 = tpu.dynamic_rotate %5 by %c15_i32 dim 1 : vector<8x256xf32>, i32 -> vector<8x256xf32>
    %17 = vector.extract_strided_slice %1 {offsets = [2, 0], sizes = [1, 256], strides = [1, 1]} : vector<9x256xf32> to vector<1x256xf32>
    %18 = vector.broadcast %17 : vector<1x256xf32> to vector<8x256xf32>
    %19 = arith.mulf %16, %18 : vector<8x256xf32>
    %c16 = arith.constant 16 : index
    %c0_9 = arith.constant 0 : index
    %20 = vector.load %arg5[%c16, %c0_9] : memref<72x256xf32, #tpu.memory_space<vmem>>, vector<8x256xf32>
    tpu.vector_store %arg5[%c16, %c0_9], %19 {strides = array<i32>} : memref<72x256xf32, #tpu.memory_space<vmem>>, vector<8x256xf32>,
    %c1_i32 = arith.constant 1 : i32
    %21 = tpu.dynamic_rotate %5 by %c1_i32 dim 1 : vector<8x256xf32>, i32 -> vector<8x256xf32>
    %22 = vector.extract_strided_slice %1 {offsets = [3, 0], sizes = [1, 256], strides = [1, 1]} : vector<9x256xf32> to vector<1x256xf32>
    %23 = vector.broadcast %22 : vector<1x256xf32> to vector<8x256xf32>
    %24 = arith.mulf %21, %23 : vector<8x256xf32>
    %c24 = arith.constant 24 : index
    %c0_10 = arith.constant 0 : index
    %25 = vector.load %arg5[%c24, %c0_10] : memref<72x256xf32, #tpu.memory_space<vmem>>, vector<8x256xf32>
    tpu.vector_store %arg5[%c24, %c0_10], %24 {strides = array<i32>} : memref<72x256xf32, #tpu.memory_space<vmem>>, vector<8x256xf32>,
    %c32 = arith.constant 32 : index
    %c0_11 = arith.constant 0 : index
    %26 = vector.load %arg5[%c32, %c0_11] : memref<72x256xf32, #tpu.memory_space<vmem>>, vector<8x256xf32>
    tpu.vector_store %arg5[%c32, %c0_11], %5 {strides = array<i32>} : memref<72x256xf32, #tpu.memory_space<vmem>>, vector<8x256xf32>,
    %c255_i32 = arith.constant 255 : i32
    %27 = tpu.dynamic_rotate %5 by %c255_i32 dim 1 : vector<8x256xf32>, i32 -> vector<8x256xf32>
    %28 = vector.extract_strided_slice %1 {offsets = [5, 0], sizes = [1, 256], strides = [1, 1]} : vector<9x256xf32> to vector<1x256xf32>
    %29 = vector.broadcast %28 : vector<1x256xf32> to vector<8x256xf32>
    %30 = arith.mulf %27, %29 : vector<8x256xf32>
    %c40 = arith.constant 40 : index
    %c0_12 = arith.constant 0 : index
    %31 = vector.load %arg5[%c40, %c0_12] : memref<72x256xf32, #tpu.memory_space<vmem>>, vector<8x256xf32>
    tpu.vector_store %arg5[%c40, %c0_12], %30 {strides = array<i32>} : memref<72x256xf32, #tpu.memory_space<vmem>>, vector<8x256xf32>,
    %c241_i32 = arith.constant 241 : i32
    %32 = tpu.dynamic_rotate %5 by %c241_i32 dim 1 : vector<8x256xf32>, i32 -> vector<8x256xf32>
    %33 = vector.extract_strided_slice %1 {offsets = [6, 0], sizes = [1, 256], strides = [1, 1]} : vector<9x256xf32> to vector<1x256xf32>
    %34 = vector.broadcast %33 : vector<1x256xf32> to vector<8x256xf32>
    %35 = arith.mulf %32, %34 : vector<8x256xf32>
    %c48 = arith.constant 48 : index
    %c0_13 = arith.constant 0 : index
    %36 = vector.load %arg5[%c48, %c0_13] : memref<72x256xf32, #tpu.memory_space<vmem>>, vector<8x256xf32>
    tpu.vector_store %arg5[%c48, %c0_13], %35 {strides = array<i32>} : memref<72x256xf32, #tpu.memory_space<vmem>>, vector<8x256xf32>,
    %c240_i32 = arith.constant 240 : i32
    %37 = tpu.dynamic_rotate %5 by %c240_i32 dim 1 : vector<8x256xf32>, i32 -> vector<8x256xf32>
    %38 = vector.extract_strided_slice %1 {offsets = [7, 0], sizes = [1, 256], strides = [1, 1]} : vector<9x256xf32> to vector<1x256xf32>
    %39 = vector.broadcast %38 : vector<1x256xf32> to vector<8x256xf32>
    %40 = arith.mulf %37, %39 : vector<8x256xf32>
    %c56 = arith.constant 56 : index
    %c0_14 = arith.constant 0 : index
    %41 = vector.load %arg5[%c56, %c0_14] : memref<72x256xf32, #tpu.memory_space<vmem>>, vector<8x256xf32>
    tpu.vector_store %arg5[%c56, %c0_14], %40 {strides = array<i32>} : memref<72x256xf32, #tpu.memory_space<vmem>>, vector<8x256xf32>,
    %c239_i32 = arith.constant 239 : i32
    %42 = tpu.dynamic_rotate %5 by %c239_i32 dim 1 : vector<8x256xf32>, i32 -> vector<8x256xf32>
    %43 = vector.extract_strided_slice %1 {offsets = [8, 0], sizes = [1, 256], strides = [1, 1]} : vector<9x256xf32> to vector<1x256xf32>
    %44 = vector.broadcast %43 : vector<1x256xf32> to vector<8x256xf32>
    %45 = arith.mulf %42, %44 : vector<8x256xf32>
    %c64 = arith.constant 64 : index
    %c0_15 = arith.constant 0 : index
    %46 = vector.load %arg5[%c64, %c0_15] : memref<72x256xf32, #tpu.memory_space<vmem>>, vector<8x256xf32>
    tpu.vector_store %arg5[%c64, %c0_15], %45 {strides = array<i32>} : memref<72x256xf32, #tpu.memory_space<vmem>>, vector<8x256xf32>,
    %c0_16 = arith.constant 0 : index
    %c0_17 = arith.constant 0 : index
    %47 = vector.load %arg5[%c0_16, %c0_17] : memref<72x256xf32, #tpu.memory_space<vmem>>, vector<72x256xf32>
    %cst_18 = arith.constant dense<0.000000e+00> : vector<8x256xf32>
    %48 = tpu.matmul %0, %47, %cst_18 {dimension_numbers = #tpu.dot_dimension_numbers<[1], [0], [0], [1], [0, 0, 1, 1], [], []>} : vector<8x72xf32>, vector<72x256xf32>, vector<8x256xf32> -> vector<8x256xf32>
    %49 = vector.shape_cast %48 : vector<8x256xf32> to vector<1x8x256xf32>
    %cst_19 = arith.constant dense<0.000000e+00> : vector<8x256xf32>
    %50 = vector.multi_reduction <add>, %49, %cst_19 [0] : vector<1x8x256xf32> to vector<8x256xf32>
    %cst_20 = arith.constant dense<0.000000e+00> : vector<8xf32>
    %51 = vector.multi_reduction <add>, %50, %cst_20 [1] : vector<8x256xf32> to vector<8xf32>
    %52 = vector.shape_cast %51 : vector<8xf32> to vector<8x1xf32>
    %cst_21 = arith.constant 3.906250e-03 : f32
    %53 = vector.broadcast %cst_21 : f32 to vector<8x1xf32>
    %54 = arith.mulf %52, %53 : vector<8x1xf32>
    %55 = vector.shape_cast %54 : vector<8x1xf32> to vector<1x8x1xf32>
    %56 = vector.broadcast %55 : vector<1x8x1xf32> to vector<1x8x256xf32>
    %57 = arith.subf %49, %56 : vector<1x8x256xf32>
    %58 = arith.mulf %57, %57 : vector<1x8x256xf32>
    %cst_22 = arith.constant dense<0.000000e+00> : vector<8x256xf32>
    %59 = vector.multi_reduction <add>, %58, %cst_22 [0] : vector<1x8x256xf32> to vector<8x256xf32>
    %cst_23 = arith.constant dense<0.000000e+00> : vector<8xf32>
    %60 = vector.multi_reduction <add>, %59, %cst_23 [1] : vector<8x256xf32> to vector<8xf32>
    %61 = vector.shape_cast %60 : vector<8xf32> to vector<8x1xf32>
    %62 = tpu.concatenate %54, %61 in 1 : vector<8x1xf32>, vector<8x1xf32> -> vector<8x2xf32>
    %c0_24 = arith.constant 0 : index
    %c0_25 = arith.constant 0 : index
    %c0_26 = arith.constant 0 : index
    %63 = vector.load %arg4[%c0_24, %c0_25, %c0_26] : memref<1x8x2xf32, #tpu.memory_space<vmem>>, vector<1x8x2xf32>
    %64 = vector.shape_cast %63 : vector<1x8x2xf32> to vector<8x2xf32>
    %65 = vector.shape_cast %62 : vector<8x2xf32> to vector<1x8x2xf32>
    tpu.vector_store %arg4[%c0_24, %c0_25, %c0_26], %65 {strides = array<i32>} : memref<1x8x2xf32, #tpu.memory_space<vmem>>, vector<1x8x2xf32>,
    return
  }
  func.func @transform_0(%arg0: i32) -> (i32, i32, i32) {
    %c0_i32 = arith.constant 0 : i32
    %c0_i32_0 = arith.constant 0 : i32
    %c0_i32_1 = arith.constant 0 : i32
    return %arg0, %c0_i32, %c0_i32_0 : i32, i32, i32
  }
  func.func @transform_1(%arg0: i32) -> (i32, i32) {
    %c0_i32 = arith.constant 0 : i32
    %c0_i32_0 = arith.constant 0 : i32
    %c0_i32_1 = arith.constant 0 : i32
    return %c0_i32, %c0_i32_0 : i32, i32
  }
  func.func @transform_2(%arg0: i32) -> (i32, i32) {
    %c0_i32 = arith.constant 0 : i32
    %c0_i32_0 = arith.constant 0 : i32
    %c0_i32_1 = arith.constant 0 : i32
    return %c0_i32, %c0_i32_0 : i32, i32
  }
  func.func @transform_3(%arg0: i32) -> (i32, i32, i32) {
    %c0_i32 = arith.constant 0 : i32
    %c0_i32_0 = arith.constant 0 : i32
    %c0_i32_1 = arith.constant 0 : i32
    return %arg0, %c0_i32, %c0_i32_0 : i32, i32, i32
  }
}

module attributes {stable_mosaic.version = 11 : i64} {
  func.func @conv_bn_relu_kernel(%arg0: i32, %arg1: memref<1x4x256xf32, #tpu.memory_space<vmem>>, %arg2: memref<8x72xf32, #tpu.memory_space<vmem>>, %arg3: memref<9x256xf32, #tpu.memory_space<vmem>>, %arg4: memref<8x1xf32, #tpu.memory_space<vmem>>, %arg5: memref<8x1xf32, #tpu.memory_space<vmem>>, %arg6: memref<1x8x256xf32, #tpu.memory_space<vmem>>, %arg7: memref<72x256xf32, #tpu.memory_space<vmem>>) attributes {dimension_semantics = [#tpu.dimension_semantics<parallel>], iteration_bounds = array<i64: 2>, scalar_prefetch = 0 : i64, scratch_operands = 1 : i64, tpu.core_type = #tpu.core_type<tc>, window_params = [{transform_indices = @transform_0, window_bounds = array<i64: 1, 4, 256>}, {pipeline_mode = #tpu.pipeline_mode<synchronous>, transform_indices = @transform_1, window_bounds = array<i64: 8, 72>}, {pipeline_mode = #tpu.pipeline_mode<synchronous>, transform_indices = @transform_2, window_bounds = array<i64: 9, 256>}, {pipeline_mode = #tpu.pipeline_mode<synchronous>, transform_indices = @transform_3, window_bounds = array<i64: 8, 1>}, {pipeline_mode = #tpu.pipeline_mode<synchronous>, transform_indices = @transform_4, window_bounds = array<i64: 8, 1>}, {transform_indices = @transform_5, window_bounds = array<i64: 1, 8, 256>}]} {
    %c0 = arith.constant 0 : index
    %c0_0 = arith.constant 0 : index
    %0 = vector.load %arg2[%c0, %c0_0] : memref<8x72xf32, #tpu.memory_space<vmem>>, vector<8x72xf32>
    %c0_1 = arith.constant 0 : index
    %c0_2 = arith.constant 0 : index
    %1 = vector.load %arg3[%c0_1, %c0_2] : memref<9x256xf32, #tpu.memory_space<vmem>>, vector<9x256xf32>
    %cst = arith.constant 0.000000e+00 : f32
    %2 = vector.broadcast %cst : f32 to vector<4x256xf32>
    %c0_3 = arith.constant 0 : index
    %c0_4 = arith.constant 0 : index
    %c0_5 = arith.constant 0 : index
    %3 = vector.load %arg1[%c0_3, %c0_4, %c0_5] : memref<1x4x256xf32, #tpu.memory_space<vmem>>, vector<1x4x256xf32>
    %4 = vector.shape_cast %3 : vector<1x4x256xf32> to vector<4x256xf32>
    %5 = tpu.concatenate %4, %2 in 0 : vector<4x256xf32>, vector<4x256xf32> -> vector<8x256xf32>
    %c17_i32 = arith.constant 17 : i32
    %6 = tpu.dynamic_rotate %5 by %c17_i32 dim 1 : vector<8x256xf32>, i32 -> vector<8x256xf32>
    %7 = vector.extract_strided_slice %1 {offsets = [0, 0], sizes = [1, 256], strides = [1, 1]} : vector<9x256xf32> to vector<1x256xf32>
    %8 = vector.broadcast %7 : vector<1x256xf32> to vector<8x256xf32>
    %9 = arith.mulf %6, %8 : vector<8x256xf32>
    %c0_6 = arith.constant 0 : index
    %c0_7 = arith.constant 0 : index
    %10 = vector.load %arg7[%c0_6, %c0_7] : memref<72x256xf32, #tpu.memory_space<vmem>>, vector<8x256xf32>
    tpu.vector_store %arg7[%c0_6, %c0_7], %9 {strides = array<i32>} : memref<72x256xf32, #tpu.memory_space<vmem>>, vector<8x256xf32>,
    %c16_i32 = arith.constant 16 : i32
    %11 = tpu.dynamic_rotate %5 by %c16_i32 dim 1 : vector<8x256xf32>, i32 -> vector<8x256xf32>
    %12 = vector.extract_strided_slice %1 {offsets = [1, 0], sizes = [1, 256], strides = [1, 1]} : vector<9x256xf32> to vector<1x256xf32>
    %13 = vector.broadcast %12 : vector<1x256xf32> to vector<8x256xf32>
    %14 = arith.mulf %11, %13 : vector<8x256xf32>
    %c8 = arith.constant 8 : index
    %c0_8 = arith.constant 0 : index
    %15 = vector.load %arg7[%c8, %c0_8] : memref<72x256xf32, #tpu.memory_space<vmem>>, vector<8x256xf32>
    tpu.vector_store %arg7[%c8, %c0_8], %14 {strides = array<i32>} : memref<72x256xf32, #tpu.memory_space<vmem>>, vector<8x256xf32>,
    %c15_i32 = arith.constant 15 : i32
    %16 = tpu.dynamic_rotate %5 by %c15_i32 dim 1 : vector<8x256xf32>, i32 -> vector<8x256xf32>
    %17 = vector.extract_strided_slice %1 {offsets = [2, 0], sizes = [1, 256], strides = [1, 1]} : vector<9x256xf32> to vector<1x256xf32>
    %18 = vector.broadcast %17 : vector<1x256xf32> to vector<8x256xf32>
    %19 = arith.mulf %16, %18 : vector<8x256xf32>
    %c16 = arith.constant 16 : index
    %c0_9 = arith.constant 0 : index
    %20 = vector.load %arg7[%c16, %c0_9] : memref<72x256xf32, #tpu.memory_space<vmem>>, vector<8x256xf32>
    tpu.vector_store %arg7[%c16, %c0_9], %19 {strides = array<i32>} : memref<72x256xf32, #tpu.memory_space<vmem>>, vector<8x256xf32>,
    %c1_i32 = arith.constant 1 : i32
    %21 = tpu.dynamic_rotate %5 by %c1_i32 dim 1 : vector<8x256xf32>, i32 -> vector<8x256xf32>
    %22 = vector.extract_strided_slice %1 {offsets = [3, 0], sizes = [1, 256], strides = [1, 1]} : vector<9x256xf32> to vector<1x256xf32>
    %23 = vector.broadcast %22 : vector<1x256xf32> to vector<8x256xf32>
    %24 = arith.mulf %21, %23 : vector<8x256xf32>
    %c24 = arith.constant 24 : index
    %c0_10 = arith.constant 0 : index
    %25 = vector.load %arg7[%c24, %c0_10] : memref<72x256xf32, #tpu.memory_space<vmem>>, vector<8x256xf32>
    tpu.vector_store %arg7[%c24, %c0_10], %24 {strides = array<i32>} : memref<72x256xf32, #tpu.memory_space<vmem>>, vector<8x256xf32>,
    %c32 = arith.constant 32 : index
    %c0_11 = arith.constant 0 : index
    %26 = vector.load %arg7[%c32, %c0_11] : memref<72x256xf32, #tpu.memory_space<vmem>>, vector<8x256xf32>
    tpu.vector_store %arg7[%c32, %c0_11], %5 {strides = array<i32>} : memref<72x256xf32, #tpu.memory_space<vmem>>, vector<8x256xf32>,
    %c255_i32 = arith.constant 255 : i32
    %27 = tpu.dynamic_rotate %5 by %c255_i32 dim 1 : vector<8x256xf32>, i32 -> vector<8x256xf32>
    %28 = vector.extract_strided_slice %1 {offsets = [5, 0], sizes = [1, 256], strides = [1, 1]} : vector<9x256xf32> to vector<1x256xf32>
    %29 = vector.broadcast %28 : vector<1x256xf32> to vector<8x256xf32>
    %30 = arith.mulf %27, %29 : vector<8x256xf32>
    %c40 = arith.constant 40 : index
    %c0_12 = arith.constant 0 : index
    %31 = vector.load %arg7[%c40, %c0_12] : memref<72x256xf32, #tpu.memory_space<vmem>>, vector<8x256xf32>
    tpu.vector_store %arg7[%c40, %c0_12], %30 {strides = array<i32>} : memref<72x256xf32, #tpu.memory_space<vmem>>, vector<8x256xf32>,
    %c241_i32 = arith.constant 241 : i32
    %32 = tpu.dynamic_rotate %5 by %c241_i32 dim 1 : vector<8x256xf32>, i32 -> vector<8x256xf32>
    %33 = vector.extract_strided_slice %1 {offsets = [6, 0], sizes = [1, 256], strides = [1, 1]} : vector<9x256xf32> to vector<1x256xf32>
    %34 = vector.broadcast %33 : vector<1x256xf32> to vector<8x256xf32>
    %35 = arith.mulf %32, %34 : vector<8x256xf32>
    %c48 = arith.constant 48 : index
    %c0_13 = arith.constant 0 : index
    %36 = vector.load %arg7[%c48, %c0_13] : memref<72x256xf32, #tpu.memory_space<vmem>>, vector<8x256xf32>
    tpu.vector_store %arg7[%c48, %c0_13], %35 {strides = array<i32>} : memref<72x256xf32, #tpu.memory_space<vmem>>, vector<8x256xf32>,
    %c240_i32 = arith.constant 240 : i32
    %37 = tpu.dynamic_rotate %5 by %c240_i32 dim 1 : vector<8x256xf32>, i32 -> vector<8x256xf32>
    %38 = vector.extract_strided_slice %1 {offsets = [7, 0], sizes = [1, 256], strides = [1, 1]} : vector<9x256xf32> to vector<1x256xf32>
    %39 = vector.broadcast %38 : vector<1x256xf32> to vector<8x256xf32>
    %40 = arith.mulf %37, %39 : vector<8x256xf32>
    %c56 = arith.constant 56 : index
    %c0_14 = arith.constant 0 : index
    %41 = vector.load %arg7[%c56, %c0_14] : memref<72x256xf32, #tpu.memory_space<vmem>>, vector<8x256xf32>
    tpu.vector_store %arg7[%c56, %c0_14], %40 {strides = array<i32>} : memref<72x256xf32, #tpu.memory_space<vmem>>, vector<8x256xf32>,
    %c239_i32 = arith.constant 239 : i32
    %42 = tpu.dynamic_rotate %5 by %c239_i32 dim 1 : vector<8x256xf32>, i32 -> vector<8x256xf32>
    %43 = vector.extract_strided_slice %1 {offsets = [8, 0], sizes = [1, 256], strides = [1, 1]} : vector<9x256xf32> to vector<1x256xf32>
    %44 = vector.broadcast %43 : vector<1x256xf32> to vector<8x256xf32>
    %45 = arith.mulf %42, %44 : vector<8x256xf32>
    %c64 = arith.constant 64 : index
    %c0_15 = arith.constant 0 : index
    %46 = vector.load %arg7[%c64, %c0_15] : memref<72x256xf32, #tpu.memory_space<vmem>>, vector<8x256xf32>
    tpu.vector_store %arg7[%c64, %c0_15], %45 {strides = array<i32>} : memref<72x256xf32, #tpu.memory_space<vmem>>, vector<8x256xf32>,
    %c0_16 = arith.constant 0 : index
    %c0_17 = arith.constant 0 : index
    %47 = vector.load %arg7[%c0_16, %c0_17] : memref<72x256xf32, #tpu.memory_space<vmem>>, vector<72x256xf32>
    %cst_18 = arith.constant dense<0.000000e+00> : vector<8x256xf32>
    %48 = tpu.matmul %0, %47, %cst_18 {dimension_numbers = #tpu.dot_dimension_numbers<[1], [0], [0], [1], [0, 0, 1, 1], [], []>} : vector<8x72xf32>, vector<72x256xf32>, vector<8x256xf32> -> vector<8x256xf32>
    %49 = vector.shape_cast %48 : vector<8x256xf32> to vector<1x8x256xf32>
    %c0_19 = arith.constant 0 : index
    %c0_20 = arith.constant 0 : index
    %50 = vector.load %arg4[%c0_19, %c0_20] : memref<8x1xf32, #tpu.memory_space<vmem>>, vector<8x1xf32>
    %51 = vector.shape_cast %50 : vector<8x1xf32> to vector<1x8x1xf32>
    %c0_21 = arith.constant 0 : index
    %c0_22 = arith.constant 0 : index
    %52 = vector.load %arg5[%c0_21, %c0_22] : memref<8x1xf32, #tpu.memory_space<vmem>>, vector<8x1xf32>
    %53 = vector.shape_cast %52 : vector<8x1xf32> to vector<1x8x1xf32>
    %54 = vector.broadcast %51 : vector<1x8x1xf32> to vector<1x8x256xf32>
    %55 = arith.mulf %49, %54 : vector<1x8x256xf32>
    %56 = vector.broadcast %53 : vector<1x8x1xf32> to vector<1x8x256xf32>
    %57 = arith.addf %55, %56 : vector<1x8x256xf32>
    %cst_23 = arith.constant 0.000000e+00 : f32
    %58 = vector.broadcast %cst_23 : f32 to vector<1x8x256xf32>
    %59 = arith.maximumf %57, %58 : vector<1x8x256xf32>
    %c0_24 = arith.constant 0 : index
    %c0_25 = arith.constant 0 : index
    %c0_26 = arith.constant 0 : index
    %60 = vector.load %arg6[%c0_24, %c0_25, %c0_26] : memref<1x8x256xf32, #tpu.memory_space<vmem>>, vector<1x8x256xf32>
    tpu.vector_store %arg6[%c0_24, %c0_25, %c0_26], %59 {strides = array<i32>} : memref<1x8x256xf32, #tpu.memory_space<vmem>>, vector<1x8x256xf32>,
    return
  }
  func.func @transform_0(%arg0: i32) -> (i32, i32, i32) {
    %c0_i32 = arith.constant 0 : i32
    %c0_i32_0 = arith.constant 0 : i32
    %c0_i32_1 = arith.constant 0 : i32
    return %arg0, %c0_i32, %c0_i32_0 : i32, i32, i32
  }
  func.func @transform_1(%arg0: i32) -> (i32, i32) {
    %c0_i32 = arith.constant 0 : i32
    %c0_i32_0 = arith.constant 0 : i32
    %c0_i32_1 = arith.constant 0 : i32
    return %c0_i32, %c0_i32_0 : i32, i32
  }
  func.func @transform_2(%arg0: i32) -> (i32, i32) {
    %c0_i32 = arith.constant 0 : i32
    %c0_i32_0 = arith.constant 0 : i32
    %c0_i32_1 = arith.constant 0 : i32
    return %c0_i32, %c0_i32_0 : i32, i32
  }
  func.func @transform_3(%arg0: i32) -> (i32, i32) {
    %c0_i32 = arith.constant 0 : i32
    %c0_i32_0 = arith.constant 0 : i32
    %c0_i32_1 = arith.constant 0 : i32
    return %c0_i32, %c0_i32_0 : i32, i32
  }
  func.func @transform_4(%arg0: i32) -> (i32, i32) {
    %c0_i32 = arith.constant 0 : i32
    %c0_i32_0 = arith.constant 0 : i32
    %c0_i32_1 = arith.constant 0 : i32
    return %c0_i32, %c0_i32_0 : i32, i32
  }
  func.func @transform_5(%arg0: i32) -> (i32, i32, i32) {
    %c0_i32 = arith.constant 0 : i32
    %c0_i32_0 = arith.constant 0 : i32
    %c0_i32_1 = arith.constant 0 : i32
    return %arg0, %c0_i32, %c0_i32_0 : i32, i32, i32
  }
}

</mosaic_0001>

<bundles_post_ra>
// kernel: block_forward.3
= control target key start
LH: loop header
LB: loop body
LE: loop exit
PB: predicated region body
PF: predicated region fallthrough
CT: control target
= control target key end

     0   :  { %s571_s18 = smov 0   ;;  %s657_s0 = inlined_call_operand.vmem [shape: f32[2,4,256], index: 0, kind: input, shape index: {}]   ;;  %s658_s1 = inlined_call_operand.vmem [shape: f32[8,72], index: 1, kind: input, shape index: {}]   ;;  %s659_s2 = inlined_call_operand.vmem [shape: f32[9,256], index: 2, kind: input, shape index: {}]   ;;  %s660_s3 = inlined_call_operand.vmem [shape: f32[8,1], index: 3, kind: input, shape index: {}]   ;;  %s661_s4 = inlined_call_operand.vmem [shape: f32[8,1], index: 4, kind: input, shape index: {}]   ;;  %s662_s5 = inlined_call_operand.vmem [shape: f32[2,8,256], index: 5, kind: output, shape index: {}]  }
   0x1 LB: > { %s485_s19 = sadd.s32 4294967295, %s530_s18   ;;  %p489_p0 = scmp.ge.s32.totalorder %s530_s18, 1  ;;  %s530_s18 = sphi %s571_s18, %s15_s18  }
   0x2   : > { %p187_p1 = scmp.lt.s32.totalorder %s530_s18, 3 }
   0x4   : > { %p188_p2 = pnand %p489_p0, %p187_p1 }
   0x5   : > { %p215_p3 = scmp.lt.s32.totalorder (!%p188_p2), %s485_s19, 1  ;;  %s532_s24 = smov (!%p188_p2), 112  }
   0x6   : > { %191 = sbr.rel (%p188_p2) target bundleno = 317 (0x13d), region = 40  ;;  %s533_s25 = smov (!%p188_p2), 111  }
   0x7   : > { %s534_s26 = smov (!%p188_p2), 113   ;;  %s535_s27 = smov (!%p188_p2), 127  }
   0x8   : > { %s536_s28 = smov (!%p188_p2), 1   ;;  %s537_s29 = smov (!%p188_p2), 15  }
   0x9   : > { %s538_s30 = smov (!%p188_p2), 16   ;;  %s539_s6 = smov (!%p188_p2), 17  }
   0xb   : > { %s664_s19 = smov (!%p215_p3, %s485_s19), 1  ;;  %vm237_vm0 = vcmask 1043456   ;;  %v244_v6 = vlaneseq  ;;  %v598_v11 = vld [vmem:[%s659_s2] sm:$0xff]  ;;  %v603_v12 = vld [vmem:[%s659_s2 + $0x8] sm:$0xff]  ;;  %v522_v13 = vld [vmem:[%s659_s2 + $0x10] ss:$0 sm:$0xff] }
   0xc   : > { %s498_s20 = sshll.u32 %s664_s19, 3  ;;  %v523_v14 = vld [vmem:[%s659_s2 + $0x18] ss:$0 sm:$0xff]  ;;  %v329_v17 = vperm.slane %v598_v11, 7  ;;  %v330_v18 = vperm.slane %v603_v12, 7  ;;  %v316_v25 = vperm.slane %v598_v11, 6 }
   0xd   : > { %s219_s23 = scalar_lea.vmem %s657_s0, %s498_s20  ;;  %v593_v9 = vand.u32 127, %v244_v6  ;;  %v317_v26 = vperm.slane %v603_v12, 6  ;;  %v303_v34 = vperm.slane %v598_v11, 5  ;;  %v304_v35 = vperm.slane %v603_v12, 5  ;;  %v410_v36 = vld [vmem:[%s660_s3] sm:$0xff] }
   0xe   : > { %v230_v0 = vld [vmem:[%s219_s23] sm:$0xff]  ;;  %v540_v38 = vmov 0   ;;  %v288_v45 = vperm.slane %v598_v11, 3  ;;  %v289_v46 = vperm.slane %v603_v12, 3  ;;  %v275_v48 = vperm.slane %v598_v11, 2  ;;  %s499_s23 = sshll.u32 %s664_s19, 4 }
   0xf   : > { %232 = vst [vmem:[#allocation1] ss:$2 sm:$0xff] %v230_v0  ;;  %vm326_vm1 = vcmp.lt.s32.totalorder %v593_v9, 112  ;;  %vm339_vm2 = vcmp.lt.s32.totalorder %v593_v9, 111  ;;  %vm313_vm3 = vcmp.lt.s32.totalorder %v593_v9, 113  ;;  %vm300_vm4 = vcmp.lt.s32.totalorder %v593_v9, 127  ;;  %519 = vset.pattern.permute.xlu1 %v540_v38  ;;  %520 = vset.pattern.permute.xlu2 %v540_v38 }
  0x10   : > { %v411_v37 = vld [vmem:[%s661_s4] sm:$0xff]  ;;  %521 = vset.pattern.permute.xlu0 %v540_v38  ;;  %vm285_vm5 = vcmp.lt.s32.totalorder %v593_v9, 1  ;;  %vm272_vm6 = vcmp.lt.s32.totalorder %v593_v9, 15  ;;  %v276_v49 = vperm.slane %v603_v12, 2  ;;  %vm259_vm7 = vcmp.lt.s32.totalorder %v593_v9, 16 }
  0x11   : > { %v262_v60 = vperm.slane %v598_v11, 1  ;;  %v263_v61 = vperm.slane %v603_v12, 1  ;;  %vm246_vm8 = vcmp.lt.s32.totalorder %v593_v9, 17  ;;  %v250_v6 = vperm.slane %v603_v12, 0 }
  0x12   : > { %vm366_vm9 = vcmask 588800  }
  0x16   : > { %v585_v1 = vld.sshfl [vmem:[#allocation1] sm:$0xff pattern:$0x75316420]  ;;  %v589_v3 = vld.sshfl [vmem:[#allocation1 + $0x8] sm:$0xff pattern:$0x75316420] }
  0x17   : > { %v238_v2 = vsel %vm237_vm0, %v585_v1, 0.0  ;;  %v239_v4 = vsel %vm237_vm0, %v589_v3, 0.0 }
  0x18   : > { %322 = vrot.lane.b32.xlu1 %v238_v2, %s532_s24  ;;  %335 = vrot.lane.b32.xlu0 %v238_v2, %s533_s25 }
  0x19   : > { %309 = vrot.lane.b32.xlu2 %v238_v2, %s534_s26 }
  0x20   : > { %324 = vrot.lane.b32.xlu1 %v239_v4, %s532_s24  ;;  %337 = vrot.lane.b32.xlu0 %v239_v4, %s533_s25 }
  0x21   : > { %311 = vrot.lane.b32.xlu2 %v239_v4, %s534_s26  ;;  %s224_s26 = scalar_lea.vmem %s662_s5, %s499_s23 }
  0x28   : > { %298 = vrot.lane.b32.xlu1 %v239_v4, %s535_s27  ;;  %296 = vrot.lane.b32.xlu0 %v238_v2, %s535_s27 }
  0x29   : > { %281 = vrot.lane.b32.xlu2 %v238_v2, %s536_s28 }
  0x30   : > { %268 = vrot.lane.b32.xlu1 %v238_v2, %s537_s29  ;;  %283 = vrot.lane.b32.xlu0 %v239_v4, %s536_s28 }
  0x31   : > { %270 = vrot.lane.b32.xlu2 %v239_v4, %s537_s29 }
  0x38   : > { %257 = vrot.lane.b32.xlu1 %v239_v4, %s538_s30  ;;  %255 = vrot.lane.b32.xlu0 %v238_v2, %s538_s30 }
  0x39   : > { %240 = vrot.lane.b32.xlu2 %v238_v2, %s539_s6 }
  0x40   : > { %242 = vrot.lane.b32.xlu0 %v239_v4, %s539_s6  ;;  %414 = vperm.xlu1 %519, %v410_v36  }
  0x41   : > { %421 = vperm.xlu2 %520, %v411_v37  }
  0x73   : > { %v310_v5 = vpop.permute.xlu2 %309 }
  0x7b   : > { %v312_v10 = vpop.permute.xlu2 %311 }
  0x7c   : > { %v314_v27 = vsel %vm313_vm3, %v310_v5, %v312_v10  ;;  %v315_v28 = vsel %vm313_vm3, %v312_v10, %v310_v5  ;;  %v249_v5 = vperm.slane %v598_v11, 0 }
  0x7d   : > { %v318_v32 = vmul.f32 %v316_v25, %v314_v27  ;;  %v319_v33 = vmul.f32 %v317_v26, %v315_v28 }
  0x83   : > { %v282_v31 = vpop.permute.xlu2 %281 }
  0x8a   : > { %v323_v7 = vpop.permute.xlu1 %322  ;;  %v336_v8 = vpop.permute.xlu0 %335 }
  0x8b   : > { %v271_v47 = vpop.permute.xlu2 %270 }
  0x92   : > { %v325_v15 = vpop.permute.xlu1 %324  ;;  %v338_v16 = vpop.permute.xlu0 %337 }
  0x93   : > { %v327_v19 = vsel %vm326_vm1, %v323_v7, %v325_v15  ;;  %v328_v20 = vsel %vm326_vm1, %v325_v15, %v323_v7  ;;  %v340_v21 = vsel %vm339_vm2, %v336_v8, %v338_v16  ;;  %v341_v22 = vsel %vm339_vm2, %v338_v16, %v336_v8  ;;  %v241_v4 = vpop.permute.xlu2 %240  ;;  %v225_v15 = vld [vmem:[%s658_s1] sm:$0xff] }
  0x94   : > { %v344_v23 = vmul.f32 %v522_v13, %v340_v21  ;;  %v345_v24 = vmul.f32 %v523_v14, %v341_v22  ;;  %v331_v29 = vmul.f32 %v329_v17, %v327_v19  ;;  %v332_v30 = vmul.f32 %v330_v18, %v328_v20 }
  0x96   : > { %377 = vmatpush.msra.mxu0 %v344_v23  ;;  %397 = vmatpush.msra.mxu1 %v345_v24 }
  0x98   : > { %378 = vmatpush.msra.mxu0 %v331_v29  ;;  %398 = vmatpush.msra.mxu1 %v332_v30 }
  0x9a   : > { %v299_v39 = vpop.permute.xlu1 %298  ;;  %379 = vmatpush.msra.mxu0 %v318_v32  ;;  %399 = vmatpush.msra.mxu1 %v319_v33  ;;  %v297_v40 = vpop.permute.xlu0 %296 }
  0x9b   : > { %v301_v41 = vsel %vm300_vm4, %v297_v40, %v299_v39  ;;  %v302_v42 = vsel %vm300_vm4, %v299_v39, %v297_v40  ;;  %v422_v16 = vpop.permute.xlu2 %421 }
  0x9c   : > { %v305_v43 = vmul.f32 %v303_v34, %v301_v41  ;;  %v306_v44 = vmul.f32 %v304_v35, %v302_v42 }
  0x9e   : > { %380 = vmatpush.msra.mxu0 %v305_v43  ;;  %400 = vmatpush.msra.mxu1 %v306_v44 }
  0xa0   : > { %500 = vmatpush.msk.msra.mxu0 %vm237_vm0, %v585_v1  ;;  %501 = vmatpush.msk.msra.mxu1 %vm237_vm0, %v589_v3 }
  0xa2   : > { %v269_v50 = vpop.permute.xlu1 %268  ;;  %v284_v51 = vpop.permute.xlu0 %283 }
  0xa3   : > { %v286_v52 = vsel %vm285_vm5, %v282_v31, %v284_v51  ;;  %v287_v53 = vsel %vm285_vm5, %v284_v51, %v282_v31  ;;  %v273_v54 = vsel %vm272_vm6, %v269_v50, %v271_v47  ;;  %v274_v55 = vsel %vm272_vm6, %v271_v47, %v269_v50 }
  0xa4   : > { %v290_v56 = vmul.f32 %v288_v45, %v287_v53  ;;  %v291_v57 = vmul.f32 %v289_v46, %v286_v52  ;;  %v277_v58 = vmul.f32 %v275_v48, %v274_v55  ;;  %v278_v59 = vmul.f32 %v276_v49, %v273_v54 }
  0xa6   : > { %382 = vmatpush.msra.mxu0 %v290_v56  ;;  %402 = vmatpush.msra.mxu1 %v291_v57 }
  0xa8   : > { %383 = vmatpush.msra.mxu0 %v277_v58  ;;  %403 = vmatpush.msra.mxu1 %v278_v59 }
  0xaa   : > { %v258_v62 = vpop.permute.xlu1 %257  ;;  %v256_v63 = vpop.permute.xlu0 %255 }
  0xab   : > { %v260_v0 = vsel %vm259_vm7, %v256_v63, %v258_v62  ;;  %v261_v1 = vsel %vm259_vm7, %v258_v62, %v256_v63 }
  0xac   : > { %v264_v2 = vmul.f32 %v262_v60, %v261_v1  ;;  %v265_v3 = vmul.f32 %v263_v61, %v260_v0 }
  0xae   : > { %384 = vmatpush.msra.mxu0 %v264_v2  ;;  %404 = vmatpush.msra.mxu1 %v265_v3 }
  0xb2   : > { %v243_v7 = vpop.permute.xlu0 %242  ;;  %v415_v9 = vpop.permute.xlu1 %414 }
  0xb3   : > { %v247_v8 = vsel %vm246_vm8, %v241_v4, %v243_v7  ;;  %v248_v10 = vsel %vm246_vm8, %v243_v7, %v241_v4 }
  0xb4   : > { %v251_v13 = vmul.f32 %v249_v5, %v248_v10  ;;  %v252_v14 = vmul.f32 %v250_v6, %v247_v8 }
  0xb6   : > { %385 = vmatpush.msra.mxu0 %v251_v13  ;;  %405 = vmatpush.msra.mxu1 %v252_v14 }
  0xb7   : > { %494 = vmatmul.msk.f32.vlgmr.msra.gmra.mxu0 %vm366_vm9, %v225_v15  ;;  %495 = vmatmul.msk.f32.vlgmr.msra.gmra.mxu1 %vm366_vm9, %v225_v15 }
 0x134   : > { %v387_v11 = vpop.f32.mrf.mxu0  ;;  %v407_v17 = vpop.f32.mrf.mxu1 }
 0x135   : > { %v417_v12 = vmul.f32 %v415_v9, %v387_v11  ;;  %v418_v18 = vmul.f32 %v415_v9, %v407_v17 }
 0x137   : > { %v424_v19 = vadd.f32 %v422_v16, %v417_v12  ;;  %v425_v20 = vadd.f32 %v422_v16, %v418_v18 }
 0x139   : > { %v426_v21 = vmax.f32 %v424_v19, 0.0  ;;  %v427_v22 = vmax.f32 %v425_v20, 0.0 }
 0x13b   : > { %428 = vst [vmem:[%s224_s26] sm:$0xff] %v426_v21 }
 0x13c   : > { %429 = vst [vmem:[%s224_s26 + $0x8] sm:$0xff] %v427_v22 }
 0x13d PF: > { %s15_s18 = sadd.s32 1, %s530_s18  }
 0x13e   : > { %p12_p4 = scmp.ge.s32.totalorder %s15_s18, 4  }
 0x140   :  { %14 = sbr.rel (!%p12_p4) target bundleno = 1 (0x1), region = 70 }

// kernel: block_forward.2
= control target key start
LH: loop header
LB: loop body
LE: loop exit
PB: predicated region body
PF: predicated region fallthrough
CT: control target
= control target key end

     0   :  { %s495_s12 = smov 0   ;;  %s574_s0 = inlined_call_operand.vmem [shape: f32[2,4,256], index: 0, kind: input, shape index: {}]   ;;  %s575_s1 = inlined_call_operand.vmem [shape: f32[8,72], index: 1, kind: input, shape index: {}]   ;;  %s576_s2 = inlined_call_operand.vmem [shape: f32[9,256], index: 2, kind: input, shape index: {}]   ;;  %s577_s3 = inlined_call_operand.vmem [shape: f32[2,8,2], index: 3, kind: output, shape index: {}]  }
   0x1 LB: > { %s426_s13 = sadd.s32 4294967295, %s465_s12   ;;  %p430_p0 = scmp.ge.s32.totalorder %s465_s12, 1  ;;  %s465_s12 = sphi %s495_s12, %s13_s12  }
   0x2   : > { %p137_p1 = scmp.lt.s32.totalorder %s465_s12, 3 }
   0x4   : > { %p138_p2 = pnand %p430_p0, %p137_p1 }
   0x5   : > { %p160_p3 = scmp.lt.s32.totalorder (!%p138_p2), %s426_s13, 1  ;;  %s467_s18 = smov (!%p138_p2), 112  }
   0x6   : > { %141 = sbr.rel (%p138_p2) target bundleno = 553 (0x229), region = 32  ;;  %s468_s19 = smov (!%p138_p2), 111  }
   0x7   : > { %s469_s20 = smov (!%p138_p2), 113   ;;  %s470_s21 = smov (!%p138_p2), 127  }
   0x8   : > { %s471_s22 = smov (!%p138_p2), 1   ;;  %s472_s23 = smov (!%p138_p2), 15  }
   0x9   : > { %s473_s24 = smov (!%p138_p2), 16   ;;  %s474_s25 = smov (!%p138_p2), 17  }
   0xb   : > { %s579_s13 = smov (!%p160_p3, %s426_s13), 1  ;;  %vm181_vm0 = vcmask 1043456   ;;  %v188_v6 = vlaneseq  ;;  %v524_v11 = vld [vmem:[%s576_s2] sm:$0xff]  ;;  %v529_v12 = vld [vmem:[%s576_s2 + $0x8] sm:$0xff]  ;;  %v457_v13 = vld [vmem:[%s576_s2 + $0x10] ss:$0 sm:$0xff] }
   0xc   : > { %s438_s14 = sshll.u32 %s579_s13, 3  ;;  %v458_v14 = vld [vmem:[%s576_s2 + $0x18] ss:$0 sm:$0xff]  ;;  %v273_v17 = vperm.slane %v524_v11, 7  ;;  %v274_v18 = vperm.slane %v529_v12, 7  ;;  %v260_v25 = vperm.slane %v524_v11, 6 }
   0xd   : > { %s164_s17 = scalar_lea.vmem %s574_s0, %s438_s14  ;;  %v519_v9 = vand.u32 127, %v188_v6  ;;  %v261_v26 = vperm.slane %v529_v12, 6  ;;  %v247_v34 = vperm.slane %v524_v11, 5  ;;  %v248_v35 = vperm.slane %v529_v12, 5  ;;  %s168_s11 = scalar_lea.vmem %s577_s3, %s438_s14 }
   0xe   : > { %v174_v0 = vld [vmem:[%s164_s17] sm:$0xff]  ;;  %v232_v42 = vperm.slane %v524_v11, 3  ;;  %v233_v43 = vperm.slane %v529_v12, 3  ;;  %v219_v45 = vperm.slane %v524_v11, 2  ;;  %v220_v46 = vperm.slane %v529_v12, 2 }
   0xf   : > { %176 = vst [vmem:[#allocation1] ss:$2 sm:$0xff] %v174_v0  ;;  %vm270_vm1 = vcmp.lt.s32.totalorder %v519_v9, 112  ;;  %vm283_vm2 = vcmp.lt.s32.totalorder %v519_v9, 111  ;;  %vm257_vm3 = vcmp.lt.s32.totalorder %v519_v9, 113  ;;  %vm244_vm4 = vcmp.lt.s32.totalorder %v519_v9, 127 }
  0x10   : > { %vm229_vm5 = vcmp.lt.s32.totalorder %v519_v9, 1  ;;  %vm216_vm6 = vcmp.lt.s32.totalorder %v519_v9, 15  ;;  %vm203_vm7 = vcmp.lt.s32.totalorder %v519_v9, 16  ;;  %v206_v57 = vperm.slane %v524_v11, 1 }
  0x11   : > { %v207_v58 = vperm.slane %v529_v12, 1  ;;  %vm190_vm8 = vcmp.lt.s32.totalorder %v519_v9, 17  ;;  %vm310_vm9 = vcmask 588800   ;;  %vm369_vm10 = vcmask 7168  }
  0x12   : > { %vm371_vm11 = vcmask 15360  }
  0x16   : > { %v511_v1 = vld.sshfl [vmem:[#allocation1] sm:$0xff pattern:$0x75316420]  ;;  %v515_v3 = vld.sshfl [vmem:[#allocation1 + $0x8] sm:$0xff pattern:$0x75316420] }
  0x17   : > { %v182_v2 = vsel %vm181_vm0, %v511_v1, 0.0  ;;  %v183_v4 = vsel %vm181_vm0, %v515_v3, 0.0 }
  0x18   : > { %266 = vrot.lane.b32.xlu1 %v182_v2, %s467_s18  ;;  %279 = vrot.lane.b32.xlu0 %v182_v2, %s468_s19 }
  0x19   : > { %253 = vrot.lane.b32.xlu2 %v182_v2, %s469_s20 }
  0x20   : > { %268 = vrot.lane.b32.xlu1 %v183_v4, %s467_s18  ;;  %281 = vrot.lane.b32.xlu0 %v183_v4, %s468_s19 }
  0x21   : > { %255 = vrot.lane.b32.xlu2 %v183_v4, %s469_s20 }
  0x28   : > { %242 = vrot.lane.b32.xlu1 %v183_v4, %s470_s21  ;;  %240 = vrot.lane.b32.xlu0 %v182_v2, %s470_s21 }
  0x29   : > { %225 = vrot.lane.b32.xlu2 %v182_v2, %s471_s22 }
  0x30   : > { %212 = vrot.lane.b32.xlu1 %v182_v2, %s472_s23  ;;  %227 = vrot.lane.b32.xlu0 %v183_v4, %s471_s22 }
  0x31   : > { %214 = vrot.lane.b32.xlu2 %v183_v4, %s472_s23 }
  0x38   : > { %201 = vrot.lane.b32.xlu1 %v183_v4, %s473_s24  ;;  %199 = vrot.lane.b32.xlu0 %v182_v2, %s473_s24 }
  0x39   : > { %184 = vrot.lane.b32.xlu2 %v182_v2, %s474_s25  ;;  %v193_v2 = vperm.slane %v524_v11, 0 }
  0x40   : > { %186 = vrot.lane.b32.xlu0 %v183_v4, %s474_s25 }
  0x73   : > { %v254_v5 = vpop.permute.xlu2 %253 }
  0x7b   : > { %v256_v10 = vpop.permute.xlu2 %255 }
  0x7c   : > { %v258_v27 = vsel %vm257_vm3, %v254_v5, %v256_v10  ;;  %v259_v28 = vsel %vm257_vm3, %v256_v10, %v254_v5  ;;  %v169_v10 = vld [vmem:[%s575_s1] sm:$0xff] }
  0x7d   : > { %v262_v32 = vmul.f32 %v260_v25, %v258_v27  ;;  %v263_v33 = vmul.f32 %v261_v26, %v259_v28 }
  0x83   : > { %v226_v31 = vpop.permute.xlu2 %225 }
  0x8a   : > { %v267_v7 = vpop.permute.xlu1 %266  ;;  %v280_v8 = vpop.permute.xlu0 %279 }
  0x8b   : > { %v215_v44 = vpop.permute.xlu2 %214 }
  0x92   : > { %v269_v15 = vpop.permute.xlu1 %268  ;;  %v282_v16 = vpop.permute.xlu0 %281 }
  0x93   : > { %v271_v19 = vsel %vm270_vm1, %v267_v7, %v269_v15  ;;  %v272_v20 = vsel %vm270_vm1, %v269_v15, %v267_v7  ;;  %v284_v21 = vsel %vm283_vm2, %v280_v8, %v282_v16  ;;  %v285_v22 = vsel %vm283_vm2, %v282_v16, %v280_v8 }
  0x94   : > { %v288_v23 = vmul.f32 %v457_v13, %v284_v21  ;;  %v289_v24 = vmul.f32 %v458_v14, %v285_v22  ;;  %v275_v29 = vmul.f32 %v273_v17, %v271_v19  ;;  %v276_v30 = vmul.f32 %v274_v18, %v272_v20 }
  0x96   : > { %321 = vmatpush.msra.mxu0 %v288_v23  ;;  %341 = vmatpush.msra.mxu1 %v289_v24 }
  0x98   : > { %322 = vmatpush.msra.mxu0 %v275_v29  ;;  %342 = vmatpush.msra.mxu1 %v276_v30 }
  0x9a   : > { %v243_v36 = vpop.permute.xlu1 %242  ;;  %323 = vmatpush.msra.mxu0 %v262_v32  ;;  %343 = vmatpush.msra.mxu1 %v263_v33  ;;  %v241_v37 = vpop.permute.xlu0 %240 }
  0x9b   : > { %v245_v38 = vsel %vm244_vm4, %v241_v37, %v243_v36  ;;  %v246_v39 = vsel %vm244_vm4, %v243_v36, %v241_v37 }
  0x9c   : > { %v249_v40 = vmul.f32 %v247_v34, %v245_v38  ;;  %v250_v41 = vmul.f32 %v248_v35, %v246_v39 }
  0x9e   : > { %324 = vmatpush.msra.mxu0 %v249_v40  ;;  %344 = vmatpush.msra.mxu1 %v250_v41 }
  0xa0   : > { %439 = vmatpush.msk.msra.mxu0 %vm181_vm0, %v511_v1  ;;  %440 = vmatpush.msk.msra.mxu1 %vm181_vm0, %v515_v3  ;;  %v185_v1 = vpop.permute.xlu2 %184  ;;  %v194_v3 = vperm.slane %v529_v12, 0 }
  0xa2   : > { %v213_v47 = vpop.permute.xlu1 %212  ;;  %v228_v48 = vpop.permute.xlu0 %227 }
  0xa3   : > { %v230_v49 = vsel %vm229_vm5, %v226_v31, %v228_v48  ;;  %v231_v50 = vsel %vm229_vm5, %v228_v48, %v226_v31  ;;  %v217_v51 = vsel %vm216_vm6, %v213_v47, %v215_v44  ;;  %v218_v52 = vsel %vm216_vm6, %v215_v44, %v213_v47 }
  0xa4   : > { %v234_v53 = vmul.f32 %v232_v42, %v231_v50  ;;  %v235_v54 = vmul.f32 %v233_v43, %v230_v49  ;;  %v221_v55 = vmul.f32 %v219_v45, %v218_v52  ;;  %v222_v56 = vmul.f32 %v220_v46, %v217_v51 }
  0xa6   : > { %326 = vmatpush.msra.mxu0 %v234_v53  ;;  %346 = vmatpush.msra.mxu1 %v235_v54 }
  0xa8   : > { %327 = vmatpush.msra.mxu0 %v221_v55  ;;  %347 = vmatpush.msra.mxu1 %v222_v56 }
  0xaa   : > { %v202_v59 = vpop.permute.xlu1 %201  ;;  %v200_v60 = vpop.permute.xlu0 %199 }
  0xab   : > { %v204_v61 = vsel %vm203_vm7, %v200_v60, %v202_v59  ;;  %v205_v62 = vsel %vm203_vm7, %v202_v59, %v200_v60 }
  0xac   : > { %v208_v63 = vmul.f32 %v206_v57, %v205_v62  ;;  %v209_v0 = vmul.f32 %v207_v58, %v204_v61 }
  0xae   : > { %328 = vmatpush.msra.mxu0 %v208_v63  ;;  %348 = vmatpush.msra.mxu1 %v209_v0 }
  0xb2   : > { %v187_v4 = vpop.permute.xlu0 %186 }
  0xb3   : > { %v191_v5 = vsel %vm190_vm8, %v185_v1, %v187_v4  ;;  %v192_v6 = vsel %vm190_vm8, %v187_v4, %v185_v1 }
  0xb4   : > { %v195_v7 = vmul.f32 %v193_v2, %v192_v6  ;;  %v196_v8 = vmul.f32 %v194_v3, %v191_v5 }
  0xb6   : > { %329 = vmatpush.msra.mxu0 %v195_v7  ;;  %349 = vmatpush.msra.mxu1 %v196_v8 }
  0xb7   : > { %434 = vmatmul.msk.f32.vlgmr.msra.gmra.mxu0 %vm310_vm9, %v169_v10  ;;  %435 = vmatmul.msk.f32.vlgmr.msra.gmra.mxu1 %vm310_vm9, %v169_v10 }
 0x134   : > { %v331_v9 = vpop.f32.mrf.mxu0  ;;  %v351_v13 = vpop.f32.mrf.mxu1 }
 0x135   : > { %v356_v11 = vadd.f32 %v351_v13, %v331_v9 }
 0x137   : > { %357 = vadd.xlane.f32.xlu1 %v356_v11 }
 0x1aa   : > { %v358_v12 = vpop.xlane.xlu1 %357 }
 0x1ab   : > { %v359_v14 = vmul.f32 0.00390625, %v358_v12 }
 0x1ad   : > { %v360_v15 = vsub.f32 %v331_v9, %v359_v14  ;;  %v361_v16 = vsub.f32 %v351_v13, %v359_v14 }
 0x1af   : > { %v362_v17 = vmul.f32 %v360_v15, %v360_v15  ;;  %v363_v18 = vmul.f32 %v361_v16, %v361_v16 }
 0x1b1   : > { %v366_v19 = vadd.f32 %v363_v18, %v362_v17 }
 0x1b3   : > { %367 = vadd.xlane.f32.xlu2 %v366_v19 }
 0x226   : > { %v368_v20 = vpop.xlane.xlu2 %367 }
 0x227   : > { %v370_v21 = vsel %vm369_vm10, %v359_v14, %v368_v20 }
 0x228   : > { %372 = vst.msk [vmem:[%s168_s11] sm:$0xff] %vm371_vm11, %v370_v21 }
 0x229 PF: > { %s13_s12 = sadd.s32 1, %s465_s12  }
 0x22a   : > { %p10_p4 = scmp.ge.s32.totalorder %s13_s12, 4  }
 0x22c   :  { %12 = sbr.rel (!%p10_p4) target bundleno = 1 (0x1), region = 62 }

</bundles_post_ra>
